<compile_context>
chip_gen: v6e
topology: v6e:2x2x1
jax: 0.10.0
libtpu: 0.0.40
codegen_flags: <defaults>
</compile_context>

<pallas_src>
import functools

import jax
import jax.numpy as jnp
from jax.experimental import pallas as pl
from jax.experimental.pallas import tpu as pltpu


def _round_up(n, m):
    return ((n + m - 1) // m) * m


def _mlp_kernel(x_ref, w1_ref, b1_ref, w2_ref, b2_ref, w3_ref, b3_ref, o_ref):
    """3-layer MLP forward for one (TB, state_dim) batch tile.

    Weights/biases are full VMEM-resident blocks (constant index maps), so the
    whole hot path (three matmuls + bias adds + ReLUs) runs on-chip with no
    intermediate HBM traffic.
    """
    x = x_ref[...]                                   # (TB, state_dim)

    # fc1 + ReLU  (MXU matmul, f32 accumulate; bias broadcast over batch)
    h1 = jnp.dot(x, w1_ref[...], preferred_element_type=jnp.float32)
    h1 = jnp.maximum(h1 + b1_ref[...], 0.0)

    # fc2 + ReLU
    h2 = jnp.dot(h1, w2_ref[...], preferred_element_type=jnp.float32)
    h2 = jnp.maximum(h2 + b2_ref[...], 0.0)

    # fc3 (linear scalar value head)
    out = jnp.dot(h2, w3_ref[...], preferred_element_type=jnp.float32)
    out = out + b3_ref[...]

    o_ref[...] = out.astype(o_ref.dtype)


def _resident_spec(shape):
    """Full-array block with constant block index -> stays VMEM-resident."""
    ndim = len(shape)
    return pl.BlockSpec(shape, lambda i, _n=ndim: (0,) * _n)


@functools.partial(jax.jit, static_argnames=("block_batch",))
def network_forward(x, params, *, block_batch=1024):
    """Forward pass y = fc3(relu(fc2(relu(fc1(x))))) via a single Pallas kernel.

    The batch axis is tiled with tiles of up to `block_batch` rows; any
    remainder is zero-padded and sliced off afterwards.
    """
    w1, b1, w2, b2, w3, b3 = params
    batch, state_dim = x.shape
    hidden_dim = w1.shape[1]

    # Biases reshaped to (1, features) for clean 2-D VMEM tiles / broadcast.
    b1 = b1.reshape(1, -1)
    b2 = b2.reshape(1, -1)
    b3 = b3.reshape(1, -1)

    # Batch tile: multiple of 8 (sublane), capped at block_batch; pad batch up
    # to a multiple of the tile so every grid step sees a full block.
    tb = min(_round_up(block_batch, 8), _round_up(batch, 8))
    padded_batch = _round_up(batch, tb)
    if padded_batch != batch:
        x = jnp.pad(x, ((0, padded_batch - batch), (0, 0)))
    grid = (padded_batch // tb,)

    flops = 2 * padded_batch * (state_dim * hidden_dim
                                + hidden_dim * hidden_dim
                                + hidden_dim * 1)
    bytes_accessed = 4 * (padded_batch * state_dim               # x in
                          + state_dim * hidden_dim + hidden_dim  # fc1
                          + hidden_dim * hidden_dim + hidden_dim # fc2
                          + hidden_dim * 1 + 1                   # fc3
                          + padded_batch * 1)                    # out

    out = pl.pallas_call(
        _mlp_kernel,
        out_shape=jax.ShapeDtypeStruct((padded_batch, 1), jnp.float32),
        grid=grid,
        in_specs=[
            pl.BlockSpec((tb, state_dim), lambda i: (i, 0)),  # x: batch-tiled
            _resident_spec(w1.shape), _resident_spec(b1.shape),
            _resident_spec(w2.shape), _resident_spec(b2.shape),
            _resident_spec(w3.shape), _resident_spec(b3.shape),
        ],
        out_specs=pl.BlockSpec((tb, 1), lambda i: (i, 0)),
        compiler_params=pltpu.CompilerParams(
            dimension_semantics=("parallel",)),   # v7x: split batch over 2 TCs
        cost_estimate=pl.CostEstimate(
            flops=flops, transcendentals=0, bytes_accessed=bytes_accessed),
    )(x, w1, b1, w2, b2, w3, b3)

    return out[:batch]


def init_params(key, state_dim, hidden_dim):
    """Deterministic parameter init (PyTorch-style uniform fan-in bounds)."""
    ks = jax.random.split(key, 6)

    def uniform(k, shape, fan_in):
        bound = 1.0 / jnp.sqrt(jnp.float32(fan_in))
        return jax.random.uniform(k, shape, jnp.float32, -bound, bound)

    # Weights stored as (in, out) -> kernel does x @ W + b (== nn.Linear math).
    w1 = uniform(ks[0], (state_dim, hidden_dim), state_dim)
    b1 = uniform(ks[1], (hidden_dim,), state_dim)
    w2 = uniform(ks[2], (hidden_dim, hidden_dim), hidden_dim)
    b2 = uniform(ks[3], (hidden_dim,), hidden_dim)
    w3 = uniform(ks[4], (hidden_dim, 1), hidden_dim)
    b3 = uniform(ks[5], (1,), hidden_dim)
    return (w1, b1, w2, b2, w3, b3)


def network_forward_ref(x, params):
    """Pure-JAX reference for correctness check."""
    w1, b1, w2, b2, w3, b3 = params
    h1 = jnp.maximum(x @ w1 + b1, 0.0)
    h2 = jnp.maximum(h1 @ w2 + b2, 0.0)
    return h2 @ w3 + b3


if __name__ == "__main__":
    key = jax.random.PRNGKey(0)
    k_param, k_x1, k_x2 = jax.random.split(key, 3)

    # Shapes matching the module defaults (e.g. CartPole state_dim=4,
    # hidden_dim=10) -- exercises non-(8,128)-aligned feature dims.
    batch, state_dim, hidden_dim = 8, 4, 10
    params = init_params(k_param, state_dim, hidden_dim)

    # Case 1: small batch (single grid step, batch tile == batch).
    x = jax.random.normal(k_x1, (batch, state_dim), dtype=jnp.float32)
    out = jax.block_until_ready(network_forward(x, params))
    ref = network_forward_ref(x, params)
    assert out.shape == (batch, 1), out.shape
    assert jnp.allclose(out, ref, atol=1e-5, rtol=1e-5), (
        f"max abs err {jnp.max(jnp.abs(out - ref))}")

    # Case 2: ragged batch + multi-step grid (exercises padding, weight
    # residency across grid steps, and batch-axis pipelining).
    batch2 = 20
    x2 = jax.random.normal(k_x2, (batch2, state_dim), dtype=jnp.float32)
    out2 = jax.block_until_ready(network_forward(x2, params, block_batch=8))
    ref2 = network_forward_ref(x2, params)
    assert out2.shape == (batch2, 1), out2.shape
    assert jnp.allclose(out2, ref2, atol=1e-5, rtol=1e-5), (
        f"max abs err {jnp.max(jnp.abs(out2 - ref2))}")

    print("KERNEL_OK")
</pallas_src>

<mosaic_0001>
module attributes {stable_mosaic.version = 11 : i64} {
  func.func @_mlp_kernel(%arg0: i32, %arg1: memref<8x4xf32, #tpu.memory_space<vmem>>, %arg2: memref<4x10xf32, #tpu.memory_space<vmem>>, %arg3: memref<1x10xf32, #tpu.memory_space<vmem>>, %arg4: memref<10x10xf32, #tpu.memory_space<vmem>>, %arg5: memref<1x10xf32, #tpu.memory_space<vmem>>, %arg6: memref<10x1xf32, #tpu.memory_space<vmem>>, %arg7: memref<1x1xf32, #tpu.memory_space<vmem>>, %arg8: memref<8x1xf32, #tpu.memory_space<vmem>>) attributes {dimension_semantics = [#tpu.dimension_semantics<parallel>], iteration_bounds = array<i64: 1>, scalar_prefetch = 0 : i64, scratch_operands = 0 : i64, tpu.core_type = #tpu.core_type<tc>, window_params = [{transform_indices = @transform_0, window_bounds = array<i64: 8, 4>}, {pipeline_mode = #tpu.pipeline_mode<synchronous>, transform_indices = @transform_1, window_bounds = array<i64: 4, 10>}, {pipeline_mode = #tpu.pipeline_mode<synchronous>, transform_indices = @transform_2, window_bounds = array<i64: 1, 10>}, {pipeline_mode = #tpu.pipeline_mode<synchronous>, transform_indices = @transform_3, window_bounds = array<i64: 10, 10>}, {pipeline_mode = #tpu.pipeline_mode<synchronous>, transform_indices = @transform_4, window_bounds = array<i64: 1, 10>}, {pipeline_mode = #tpu.pipeline_mode<synchronous>, transform_indices = @transform_5, window_bounds = array<i64: 10, 1>}, {pipeline_mode = #tpu.pipeline_mode<synchronous>, transform_indices = @transform_6, window_bounds = array<i64: 1, 1>}, {transform_indices = @transform_7, window_bounds = array<i64: 8, 1>}]} {
    %c0 = arith.constant 0 : index
    %c0_0 = arith.constant 0 : index
    %0 = vector.load %arg1[%c0, %c0_0] : memref<8x4xf32, #tpu.memory_space<vmem>>, vector<8x4xf32>
    %c0_1 = arith.constant 0 : index
    %c0_2 = arith.constant 0 : index
    %1 = vector.load %arg2[%c0_1, %c0_2] : memref<4x10xf32, #tpu.memory_space<vmem>>, vector<4x10xf32>
    %cst = arith.constant dense<0.000000e+00> : vector<8x10xf32>
    %2 = tpu.matmul %0, %1, %cst {dimension_numbers = #tpu.dot_dimension_numbers<[1], [0], [0], [1], [0, 0, 1, 1], [], []>} : vector<8x4xf32>, vector<4x10xf32>, vector<8x10xf32> -> vector<8x10xf32>
    %c0_3 = arith.constant 0 : index
    %c0_4 = arith.constant 0 : index
    %3 = vector.load %arg3[%c0_3, %c0_4] : memref<1x10xf32, #tpu.memory_space<vmem>>, vector<1x10xf32>
    %4 = vector.broadcast %3 : vector<1x10xf32> to vector<8x10xf32>
    %5 = arith.addf %2, %4 : vector<8x10xf32>
    %cst_5 = arith.constant 0.000000e+00 : f32
    %6 = vector.broadcast %cst_5 : f32 to vector<8x10xf32>
    %7 = arith.maximumf %5, %6 : vector<8x10xf32>
    %c0_6 = arith.constant 0 : index
    %c0_7 = arith.constant 0 : index
    %8 = vector.load %arg4[%c0_6, %c0_7] : memref<10x10xf32, #tpu.memory_space<vmem>>, vector<10x10xf32>
    %cst_8 = arith.constant dense<0.000000e+00> : vector<8x10xf32>
    %9 = tpu.matmul %7, %8, %cst_8 {dimension_numbers = #tpu.dot_dimension_numbers<[1], [0], [0], [1], [0, 0, 1, 1], [], []>} : vector<8x10xf32>, vector<10x10xf32>, vector<8x10xf32> -> vector<8x10xf32>
    %c0_9 = arith.constant 0 : index
    %c0_10 = arith.constant 0 : index
    %10 = vector.load %arg5[%c0_9, %c0_10] : memref<1x10xf32, #tpu.memory_space<vmem>>, vector<1x10xf32>
    %11 = vector.broadcast %10 : vector<1x10xf32> to vector<8x10xf32>
    %12 = arith.addf %9, %11 : vector<8x10xf32>
    %cst_11 = arith.constant 0.000000e+00 : f32
    %13 = vector.broadcast %cst_11 : f32 to vector<8x10xf32>
    %14 = arith.maximumf %12, %13 : vector<8x10xf32>
    %c0_12 = arith.constant 0 : index
    %c0_13 = arith.constant 0 : index
    %15 = vector.load %arg6[%c0_12, %c0_13] : memref<10x1xf32, #tpu.memory_space<vmem>>, vector<10x1xf32>
    %cst_14 = arith.constant dense<0.000000e+00> : vector<8x1xf32>
    %16 = tpu.matmul %14, %15, %cst_14 {dimension_numbers = #tpu.dot_dimension_numbers<[1], [0], [0], [1], [0, 0, 1, 1], [], []>} : vector<8x10xf32>, vector<10x1xf32>, vector<8x1xf32> -> vector<8x1xf32>
    %c0_15 = arith.constant 0 : index
    %c0_16 = arith.constant 0 : index
    %17 = vector.load %arg7[%c0_15, %c0_16] : memref<1x1xf32, #tpu.memory_space<vmem>>, vector<1x1xf32>
    %18 = vector.broadcast %17 : vector<1x1xf32> to vector<8x1xf32>
    %19 = arith.addf %16, %18 : vector<8x1xf32>
    %c0_17 = arith.constant 0 : index
    %c0_18 = arith.constant 0 : index
    %20 = vector.load %arg8[%c0_17, %c0_18] : memref<8x1xf32, #tpu.memory_space<vmem>>, vector<8x1xf32>
    tpu.vector_store %arg8[%c0_17, %c0_18], %19 {strides = array<i32>} : memref<8x1xf32, #tpu.memory_space<vmem>>, vector<8x1xf32>,
    return
  }
  func.func @transform_0(%arg0: i32) -> (i32, i32) {
    %c0_i32 = arith.constant 0 : i32
    %c0_i32_0 = arith.constant 0 : i32
    return %arg0, %c0_i32 : i32, i32
  }
  func.func @transform_1(%arg0: i32) -> (i32, i32) {
    %c0_i32 = arith.constant 0 : i32
    %c0_i32_0 = arith.constant 0 : i32
    %c0_i32_1 = arith.constant 0 : i32
    return %c0_i32, %c0_i32_0 : i32, i32
  }
  func.func @transform_2(%arg0: i32) -> (i32, i32) {
    %c0_i32 = arith.constant 0 : i32
    %c0_i32_0 = arith.constant 0 : i32
    %c0_i32_1 = arith.constant 0 : i32
    return %c0_i32, %c0_i32_0 : i32, i32
  }
  func.func @transform_3(%arg0: i32) -> (i32, i32) {
    %c0_i32 = arith.constant 0 : i32
    %c0_i32_0 = arith.constant 0 : i32
    %c0_i32_1 = arith.constant 0 : i32
    return %c0_i32, %c0_i32_0 : i32, i32
  }
  func.func @transform_4(%arg0: i32) -> (i32, i32) {
    %c0_i32 = arith.constant 0 : i32
    %c0_i32_0 = arith.constant 0 : i32
    %c0_i32_1 = arith.constant 0 : i32
    return %c0_i32, %c0_i32_0 : i32, i32
  }
  func.func @transform_5(%arg0: i32) -> (i32, i32) {
    %c0_i32 = arith.constant 0 : i32
    %c0_i32_0 = arith.constant 0 : i32
    %c0_i32_1 = arith.constant 0 : i32
    return %c0_i32, %c0_i32_0 : i32, i32
  }
  func.func @transform_6(%arg0: i32) -> (i32, i32) {
    %c0_i32 = arith.constant 0 : i32
    %c0_i32_0 = arith.constant 0 : i32
    %c0_i32_1 = arith.constant 0 : i32
    return %c0_i32, %c0_i32_0 : i32, i32
  }
  func.func @transform_7(%arg0: i32) -> (i32, i32) {
    %c0_i32 = arith.constant 0 : i32
    %c0_i32_0 = arith.constant 0 : i32
    return %arg0, %c0_i32 : i32, i32
  }
}

</mosaic_0001>

<bundles_post_ra>
// kernel: network_forward.1
= control target key start
LH: loop header
LB: loop body
LE: loop exit
PB: predicated region body
PF: predicated region fallthrough
CT: control target
= control target key end

     0   :  { %vm41_vm0 = vcmask 1043456   ;;  %vm37_vm1 = vcmask 31744   ;;  %v333_v0 = vmov 0.0   ;;  %vm334_vm2 = vmmov 0   ;;  %s407_s1 = inlined_call_operand.vmem [shape: f32[4,10], index: 1, kind: input, shape index: {}]   ;;  %s408_s0 = inlined_call_operand.vmem [shape: f32[8,4], index: 0, kind: input, shape index: {}]   ;;  %s409_s3 = inlined_call_operand.vmem [shape: f32[10,10], index: 3, kind: input, shape index: {}]   ;;  %s410_s2 = inlined_call_operand.vmem [shape: f32[1,10], index: 2, kind: input, shape index: {}]   ;;  %s411_s5 = inlined_call_operand.vmem [shape: f32[10,1], index: 5, kind: input, shape index: {}]   ;;  %s412_s6 = inlined_call_operand.<no memory space> [shape: f32[1,1], index: 6, kind: input, shape index: {}]   ;;  %s413_s4 = inlined_call_operand.vmem [shape: f32[1,10], index: 4, kind: input, shape index: {}]   ;;  %s414_s7 = inlined_call_operand.vmem [shape: f32[8,1], index: 7, kind: output, shape index: {}]  }
   0x1   :  { %312 = vmatprep.subr.mxu0 %v333_v0  ;;  %v29_v1 = vld [vmem:[%s407_s1] sm:$0xf]  ;;  %314 = vmatprep.mubr.msk.f32.mxu0 %vm334_vm2, %v333_v0  ;;  %v117_v3 = vld [vmem:[%s409_s3 + $0x8] sm:$0x3]  ;;  %vm129_vm3 = vcmask 1041408   ;;  %vm125_vm4 = vcmask 80896   ;;  %v12_v12 = vstv %s412_s6 }
   0x2   :  { %v28_v2 = vld [vmem:[%s408_s0] sm:$0xff]  ;;  %313 = vmatpush3.msk.msra.mxu0 %vm41_vm0, %v29_v1  ;;  %317 = vmatprep.subr.mxu1 %v333_v0  ;;  %v205_v10 = vld [vmem:[%s411_s5 + $0x8] sm:$0x3]  ;;  %13 = vst [vmem:[#allocation2] sm:$0x1] %v12_v12  ;;  %vm289_vm5 = vcmask 7168  }
   0x3   :  { %315 = vmatmul.mubr.msk.f32.vlgmr.msra.gmra.mxu0 %vm37_vm1, %v28_v2  ;;  %321 = vmatprep.mubr.msk.f32.mxu1 %vm334_vm2, %v333_v0  ;;  %v116_v4 = vld [vmem:[%s409_s3] sm:$0xff] }
   0x4   :  { %324 = vmatprep.subr.mxu0 %v333_v0  ;;  %328 = vmatprep.mubr.msk.f32.mxu0 %vm334_vm2, %v333_v0  ;;  %v295_v5 = vld [vmem:[%s410_s2] ss:$0 sm:$0xff] }
   0x5   :  { %318 = vmatpush3.msk.msra.mxu1 %vm129_vm3, %v117_v3  ;;  %325 = vmatpush3.msk.msra.mxu0 %vm129_vm3, %v205_v10  ;;  %v204_v11 = vld [vmem:[%s411_s5] sm:$0xff] }
   0x6   :  { %319 = vmatprep.subr.mxu1 %v333_v0  ;;  %326 = vmatprep.subr.mxu0 %v333_v0  ;;  %v298_v13 = vld [vmem:[%s413_s4] ss:$0 sm:$0xff] }
   0x7   :  { %320 = vmatpush3.msra.mxu1 %v116_v4  ;;  %327 = vmatpush3.msra.mxu0 %v204_v11 }
   0x9   :  { %v301_v18 = vld [vmem:[#allocation2] ss:$0 sm:$0xff] }
  0xc3   :  { %v111_v6 = vpop.f32.mrf.mxu0 }
  0xc4   :  { %v112_v7 = vadd.f32 %v295_v5, %v111_v6 }
  0xc5   :  { %v316_v8 = vpop.f32.mrf.mxu0 }
  0xc6   :  { %v115_v9 = vmax.f32 %v112_v7, 0.0 }
  0xc8   :  { %322 = vmatmul.mubr.msk.f32.vlgmr.msra.gmra.mxu1 %vm125_vm4, %v115_v9 }
 0x188   :  { %v199_v14 = vpop.f32.mrf.mxu1 }
 0x189   :  { %v200_v15 = vadd.f32 %v298_v13, %v199_v14 }
 0x18a   :  { %v323_v16 = vpop.f32.mrf.mxu1 }
 0x18b   :  { %v203_v17 = vmax.f32 %v200_v15, 0.0 }
 0x18d   :  { %329 = vmatmul.mubr.msk.f32.vlgmr.msra.gmra.mxu0 %vm125_vm4, %v203_v17 }
 0x24d   :  { %v285_v19 = vpop.f32.mrf.mxu0 }
 0x24e   :  { %v286_v20 = vadd.f32 %v301_v18, %v285_v19 }
 0x24f   :  { %v330_v21 = vpop.f32.mrf.mxu0 }
 0x250   :  { %290 = vst.msk [vmem:[%s414_s7] sm:$0xff] %vm289_vm5, %v286_v20 }

</bundles_post_ra>
